<compile_context>
chip_gen: v7x
topology: tpu7x:2x2x1
jax: 0.10.0
libtpu: 0.0.40
codegen_flags: <defaults>
</compile_context>

<pallas_src>
import functools
import math

import jax
import jax.numpy as jnp
from jax.experimental import pallas as pl
from jax.experimental.pallas import tpu as pltpu


# ----------------------------- in-kernel helpers -----------------------------
def _layernorm(x, gamma, beta, eps=1e-5):
    mean = jnp.mean(x, axis=-1, keepdims=True)
    var = jnp.mean((x - mean) ** 2, axis=-1, keepdims=True)
    return (x - mean) * jax.lax.rsqrt(var + eps) * gamma + beta


def _gelu_exact(x):
    # PyTorch F.gelu default is the exact (erf) formulation.
    return 0.5 * x * (1.0 + jax.lax.erf(x * (1.0 / math.sqrt(2.0))))


# --------------------------------- kernel ------------------------------------
def decoder_layer_kernel(x_ref, wqkv_ref, bqkv_ref, wo_ref, bo_ref,
                         g1_ref, be1_ref, w1_ref, bb1_ref, w2_ref, bb2_ref,
                         g2_ref, be2_ref, o_ref, *, n_heads, head_dim):
    x_f32 = x_ref[0]                                   # (S, E) f32
    x_bf = x_f32.astype(jnp.bfloat16)                  # bf16 copy for the MXU
    S = x_f32.shape[0]
    E = n_heads * head_dim
    scale = 1.0 / math.sqrt(head_dim)

    # ---- fused QKV projection: bf16 x bf16 -> f32 accumulate on the MXU ----
    qkv = jnp.dot(x_bf, wqkv_ref[...], preferred_element_type=jnp.float32)
    qkv = qkv + bqkv_ref[...]                          # (S, 3E) f32
    q_bf = (qkv[:, 0 * E:1 * E] * scale).astype(jnp.bfloat16)   # pre-scaled q
    k_bf = qkv[:, 1 * E:2 * E].astype(jnp.bfloat16)
    v_bf = qkv[:, 2 * E:3 * E].astype(jnp.bfloat16)

    # ---- per-head attention, accumulated directly through W_o (no concat) ----
    attn = jnp.zeros((S, E), jnp.float32)
    for h in range(n_heads):
        lo = h * head_dim
        qh = q_bf[:, lo:lo + head_dim]
        kh = k_bf[:, lo:lo + head_dim]
        vh = v_bf[:, lo:lo + head_dim]
        s = jnp.dot(qh, kh.T, preferred_element_type=jnp.float32)        # (S, S) f32
        s = s - jnp.max(s, axis=-1, keepdims=True)
        p = jnp.exp(s)                                                   # un-normalized
        denom = jnp.sum(p, axis=-1, keepdims=True)                       # (S, 1)
        oh = jnp.dot(p.astype(jnp.bfloat16), vh,
                     preferred_element_type=jnp.float32)                 # (S, Dh) f32
        # deferred softmax denominator: O(S*Dh) mult + EUP reciprocal (not O(S*S) div)
        oh = oh * pl.reciprocal(denom, approx=True)
        # rows lo:lo+Dh of W_o^T correspond to head h -> accumulate its projection
        attn = attn + jnp.dot(oh.astype(jnp.bfloat16),
                              wo_ref[lo:lo + head_dim, :],
                              preferred_element_type=jnp.float32)
    attn = attn + bo_ref[...]

    # ---- residual + norm1 (f32 elementwise) ----
    y = _layernorm(x_f32 + attn, g1_ref[...], be1_ref[...])

    # ---- feed-forward (E -> 4E -> E) + residual + norm2 ----
    h1 = jnp.dot(y.astype(jnp.bfloat16), w1_ref[...],
                 preferred_element_type=jnp.float32) + bb1_ref[...]
    h1 = _gelu_exact(h1)                                                # f32 GELU
    ff = jnp.dot(h1.astype(jnp.bfloat16), w2_ref[...],
                 preferred_element_type=jnp.float32) + bb2_ref[...]
    o_ref[0] = _layernorm(y + ff, g2_ref[...], be2_ref[...])


# -------------------------------- wrapper -------------------------------------
def _vmem_limit_bytes(S, E):
    bf16, f32 = 2, 4
    weight_bytes = (3 * E * E + E * E + 4 * E * E + 4 * E * E) * bf16    # bf16 weights
    small_bytes = (3 * E + E + 4 * E + E + 4 * E) * f32                  # biases / LN params
    act_block = S * E * f32                                              # (1, S, E) block
    intermediates = (3 * S * E + 4 * S * E + 4 * S * E) * f32            # qkv, h1, slack
    # weights + in/out activation blocks are double-buffered by the pipeline
    est = 2 * (weight_bytes + small_bytes) + 4 * act_block + intermediates
    return int(min(max(est + (8 << 20), 32 << 20), 100 << 20))


def vit_decoder_layer_bse(x_bse, params, n_heads):
    """Core entry point: activations already in (B, S, E) layout."""
    B, S, E = x_bse.shape
    head_dim = E // n_heads

    weight_args = (
        params["w_qkv_T"], params["b_qkv"], params["w_o_T"], params["b_o"],
        params["g1"], params["be1"], params["w1_T"], params["bb1"],
        params["w2_T"], params["bb2"], params["g2"], params["be2"],
    )

    in_specs = [pl.BlockSpec((1, S, E), lambda b: (b, 0, 0))]
    for w in weight_args:  # full (untiled) weight blocks, constant index across the grid
        in_specs.append(pl.BlockSpec(w.shape, lambda b, _n=w.ndim: (0,) * _n))

    kernel = functools.partial(decoder_layer_kernel, n_heads=n_heads, head_dim=head_dim)

    return pl.pallas_call(
        kernel,
        out_shape=jax.ShapeDtypeStruct((B, S, E), jnp.float32),
        grid_spec=pltpu.PrefetchScalarGridSpec(
            num_scalar_prefetch=0,
            grid=(B,),                       # B even -> both v7x TensorCores get work
            in_specs=in_specs,
            out_specs=pl.BlockSpec((1, S, E), lambda b: (b, 0, 0)),
        ),
        compiler_params=pltpu.CompilerParams(
            dimension_semantics=("parallel",),
            vmem_limit_bytes=_vmem_limit_bytes(S, E),
        ),
    )(x_bse, *weight_args)


def vit_decoder_layer(x_sbe, params, n_heads):
    """PyTorch-interface wrapper: (S, B, E) in/out (batch_first=False).

    The two transposes are interface plumbing only; when stacking many layers,
    keep activations B-major and call vit_decoder_layer_bse directly to avoid
    two HBM relayout passes per layer.
    """
    out = vit_decoder_layer_bse(jnp.transpose(x_sbe, (1, 0, 2)), params, n_heads)
    return jnp.transpose(out, (1, 0, 2))


# ------------------------- parameters (deterministic) --------------------------
def init_params(key, E):
    ks = jax.random.split(key, 12)

    def u(k, shape, scale=0.1):
        return (jax.random.uniform(k, shape, jnp.float32) - 0.5) * 2.0 * scale

    raw = dict(
        w_qkv=u(ks[0], (3 * E, E)),      # PyTorch in_proj_weight
        b_qkv=u(ks[1], (3 * E,)),
        w_o=u(ks[2], (E, E)),            # out_proj.weight
        b_o=u(ks[3], (E,)),
        g1=1.0 + u(ks[4], (E,)),         # norm1.weight
        be1=u(ks[5], (E,)),              # norm1.bias
        w1=u(ks[6], (4 * E, E)),         # ff[0].weight
        b1=u(ks[7], (4 * E,)),
        w2=u(ks[8], (E, 4 * E)),         # ff[2].weight
        b2=u(ks[9], (E,)),
        g2=1.0 + u(ks[10], (E,)),        # norm2.weight
        be2=u(ks[11], (E,)),             # norm2.bias
    )
    bf = jnp.bfloat16
    params = dict(
        w_qkv_T=raw["w_qkv"].T.astype(bf), b_qkv=raw["b_qkv"][None, :],
        w_o_T=raw["w_o"].T.astype(bf), b_o=raw["b_o"][None, :],
        g1=raw["g1"][None, :], be1=raw["be1"][None, :],
        w1_T=raw["w1"].T.astype(bf), bb1=raw["b1"][None, :],
        w2_T=raw["w2"].T.astype(bf), bb2=raw["b2"][None, :],
        g2=raw["g2"][None, :], be2=raw["be2"][None, :],
    )
    return raw, params


# ------------------------------ pure-JAX reference ------------------------------
def reference(x_sbe, raw, n_heads):
    x = jnp.transpose(x_sbe, (1, 0, 2))            # (B, S, E)
    B, S, E = x.shape
    Dh = E // n_heads

    qkv = jnp.einsum("bse,fe->bsf", x, raw["w_qkv"]) + raw["b_qkv"]
    q, k, v = jnp.split(qkv, 3, axis=-1)
    qh = q.reshape(B, S, n_heads, Dh)
    kh = k.reshape(B, S, n_heads, Dh)
    vh = v.reshape(B, S, n_heads, Dh)
    s = jnp.einsum("bshd,bthd->bhst", qh, kh) / math.sqrt(Dh)
    p = jax.nn.softmax(s, axis=-1)
    a = jnp.einsum("bhst,bthd->bshd", p, vh).reshape(B, S, E)
    attn = a @ raw["w_o"].T + raw["b_o"]

    def ln(z, g, b):
        m = jnp.mean(z, -1, keepdims=True)
        var = jnp.mean((z - m) ** 2, -1, keepdims=True)
        return (z - m) * jax.lax.rsqrt(var + 1e-5) * g + b

    y = ln(x + attn, raw["g1"], raw["be1"])
    h = jax.nn.gelu(y @ raw["w1"].T + raw["b1"], approximate=False)
    ff = h @ raw["w2"].T + raw["b2"]
    out = ln(y + ff, raw["g2"], raw["be2"])
    return jnp.transpose(out, (1, 0, 2))


if __name__ == "__main__":
    S, B, E, H = 8, 2, 32, 4                       # seq, batch, embed_dim, n_heads
    key = jax.random.PRNGKey(0)
    kx, kp = jax.random.split(key)
    x = jax.random.normal(kx, (S, B, E), dtype=jnp.float32)
    raw, params = init_params(kp, E)

    out = vit_decoder_layer(x, params, H)
    out = jax.block_until_ready(out)

    ref = reference(x, raw, H)
    assert out.shape == (S, B, E)
    # bf16 MXU inputs + approximate softmax reciprocal -> bf16-level parity tolerance
    err = float(jnp.max(jnp.abs(out - ref)))
    assert err < 5e-2, f"max abs err {err}"
    print("KERNEL_OK")
</pallas_src>

<mosaic_0001>
module attributes {stable_mosaic.version = 11 : i64} {
  func.func @decoder_layer_kernel(%arg0: i32, %arg1: memref<1x8x32xf32, #tpu.memory_space<vmem>>, %arg2: memref<32x96xbf16, #tpu.memory_space<vmem>>, %arg3: memref<1x96xf32, #tpu.memory_space<vmem>>, %arg4: memref<32x32xbf16, #tpu.memory_space<vmem>>, %arg5: memref<1x32xf32, #tpu.memory_space<vmem>>, %arg6: memref<1x32xf32, #tpu.memory_space<vmem>>, %arg7: memref<1x32xf32, #tpu.memory_space<vmem>>, %arg8: memref<32x128xbf16, #tpu.memory_space<vmem>>, %arg9: memref<1x128xf32, #tpu.memory_space<vmem>>, %arg10: memref<128x32xbf16, #tpu.memory_space<vmem>>, %arg11: memref<1x32xf32, #tpu.memory_space<vmem>>, %arg12: memref<1x32xf32, #tpu.memory_space<vmem>>, %arg13: memref<1x32xf32, #tpu.memory_space<vmem>>, %arg14: memref<1x8x32xf32, #tpu.memory_space<vmem>>) attributes {dimension_semantics = [#tpu.dimension_semantics<parallel>], iteration_bounds = array<i64: 2>, scalar_prefetch = 0 : i64, scratch_operands = 0 : i64, tpu.core_type = #tpu.core_type<tc>, window_params = [{transform_indices = @transform_0, window_bounds = array<i64: 1, 8, 32>}, {pipeline_mode = #tpu.pipeline_mode<synchronous>, transform_indices = @transform_1, window_bounds = array<i64: 32, 96>}, {pipeline_mode = #tpu.pipeline_mode<synchronous>, transform_indices = @transform_2, window_bounds = array<i64: 1, 96>}, {pipeline_mode = #tpu.pipeline_mode<synchronous>, transform_indices = @transform_3, window_bounds = array<i64: 32, 32>}, {pipeline_mode = #tpu.pipeline_mode<synchronous>, transform_indices = @transform_4, window_bounds = array<i64: 1, 32>}, {pipeline_mode = #tpu.pipeline_mode<synchronous>, transform_indices = @transform_5, window_bounds = array<i64: 1, 32>}, {pipeline_mode = #tpu.pipeline_mode<synchronous>, transform_indices = @transform_6, window_bounds = array<i64: 1, 32>}, {pipeline_mode = #tpu.pipeline_mode<synchronous>, transform_indices = @transform_7, window_bounds = array<i64: 32, 128>}, {pipeline_mode = #tpu.pipeline_mode<synchronous>, transform_indices = @transform_8, window_bounds = array<i64: 1, 128>}, {pipeline_mode = #tpu.pipeline_mode<synchronous>, transform_indices = @transform_9, window_bounds = array<i64: 128, 32>}, {pipeline_mode = #tpu.pipeline_mode<synchronous>, transform_indices = @transform_10, window_bounds = array<i64: 1, 32>}, {pipeline_mode = #tpu.pipeline_mode<synchronous>, transform_indices = @transform_11, window_bounds = array<i64: 1, 32>}, {pipeline_mode = #tpu.pipeline_mode<synchronous>, transform_indices = @transform_12, window_bounds = array<i64: 1, 32>}, {transform_indices = @transform_13, window_bounds = array<i64: 1, 8, 32>}]} {
    %c0 = arith.constant 0 : index
    %c0_0 = arith.constant 0 : index
    %c0_1 = arith.constant 0 : index
    %0 = vector.load %arg1[%c0, %c0_0, %c0_1] : memref<1x8x32xf32, #tpu.memory_space<vmem>>, vector<1x8x32xf32>
    %1 = vector.shape_cast %0 : vector<1x8x32xf32> to vector<8x32xf32>
    %2 = arith.truncf %1 : vector<8x32xf32> to vector<8x32xbf16>
    %c0_2 = arith.constant 0 : index
    %c0_3 = arith.constant 0 : index
    %3 = vector.load %arg2[%c0_2, %c0_3] : memref<32x96xbf16, #tpu.memory_space<vmem>>, vector<32x96xbf16>
    %cst = arith.constant dense<0.000000e+00> : vector<8x96xf32>
    %4 = tpu.matmul %2, %3, %cst {dimension_numbers = #tpu.dot_dimension_numbers<[1], [0], [0], [1], [0, 0, 1, 1], [], []>} : vector<8x32xbf16>, vector<32x96xbf16>, vector<8x96xf32> -> vector<8x96xf32>
    %c0_4 = arith.constant 0 : index
    %c0_5 = arith.constant 0 : index
    %5 = vector.load %arg3[%c0_4, %c0_5] : memref<1x96xf32, #tpu.memory_space<vmem>>, vector<1x96xf32>
    %6 = vector.broadcast %5 : vector<1x96xf32> to vector<8x96xf32>
    %7 = arith.addf %4, %6 : vector<8x96xf32>
    %8 = vector.extract_strided_slice %7 {offsets = [0, 0], sizes = [8, 32], strides = [1, 1]} : vector<8x96xf32> to vector<8x32xf32>
    %cst_6 = arith.constant 0.353553385 : f32
    %9 = vector.broadcast %cst_6 : f32 to vector<8x32xf32>
    %10 = arith.mulf %8, %9 : vector<8x32xf32>
    %11 = arith.truncf %10 : vector<8x32xf32> to vector<8x32xbf16>
    %12 = vector.extract_strided_slice %7 {offsets = [0, 32], sizes = [8, 32], strides = [1, 1]} : vector<8x96xf32> to vector<8x32xf32>
    %13 = arith.truncf %12 : vector<8x32xf32> to vector<8x32xbf16>
    %14 = vector.extract_strided_slice %7 {offsets = [0, 64], sizes = [8, 32], strides = [1, 1]} : vector<8x96xf32> to vector<8x32xf32>
    %15 = arith.truncf %14 : vector<8x32xf32> to vector<8x32xbf16>
    %cst_7 = arith.constant 0.000000e+00 : f32
    %16 = vector.broadcast %cst_7 : f32 to vector<8x32xf32>
    %17 = vector.extract_strided_slice %11 {offsets = [0, 0], sizes = [8, 8], strides = [1, 1]} : vector<8x32xbf16> to vector<8x8xbf16>
    %18 = vector.extract_strided_slice %13 {offsets = [0, 0], sizes = [8, 8], strides = [1, 1]} : vector<8x32xbf16> to vector<8x8xbf16>
    %19 = vector.extract_strided_slice %15 {offsets = [0, 0], sizes = [8, 8], strides = [1, 1]} : vector<8x32xbf16> to vector<8x8xbf16>
    %20 = tpu.transpose %18, [1, 0] : vector<8x8xbf16> -> vector<8x8xbf16>
    %cst_8 = arith.constant dense<0.000000e+00> : vector<8x8xf32>
    %21 = tpu.matmul %17, %20, %cst_8 {dimension_numbers = #tpu.dot_dimension_numbers<[1], [0], [0], [1], [0, 0, 1, 1], [], []>} : vector<8x8xbf16>, vector<8x8xbf16>, vector<8x8xf32> -> vector<8x8xf32>
    %cst_9 = arith.constant dense<0xFF800000> : vector<8xf32>
    %22 = vector.multi_reduction <maximumf>, %21, %cst_9 [1] : vector<8x8xf32> to vector<8xf32>
    %23 = vector.shape_cast %22 : vector<8xf32> to vector<8x1xf32>
    %24 = vector.broadcast %23 : vector<8x1xf32> to vector<8x8xf32>
    %25 = arith.subf %21, %24 : vector<8x8xf32>
    %26 = math.exp %25 : vector<8x8xf32>
    %cst_10 = arith.constant dense<0.000000e+00> : vector<8xf32>
    %27 = vector.multi_reduction <add>, %26, %cst_10 [1] : vector<8x8xf32> to vector<8xf32>
    %28 = vector.shape_cast %27 : vector<8xf32> to vector<8x1xf32>
    %29 = arith.truncf %26 : vector<8x8xf32> to vector<8x8xbf16>
    %cst_11 = arith.constant dense<0.000000e+00> : vector<8x8xf32>
    %30 = tpu.matmul %29, %19, %cst_11 {dimension_numbers = #tpu.dot_dimension_numbers<[1], [0], [0], [1], [0, 0, 1, 1], [], []>} : vector<8x8xbf16>, vector<8x8xbf16>, vector<8x8xf32> -> vector<8x8xf32>
    %31 = tpu.reciprocal %28 {approx = true} : vector<8x1xf32> -> vector<8x1xf32>
    %32 = vector.broadcast %31 : vector<8x1xf32> to vector<8x8xf32>
    %33 = arith.mulf %30, %32 : vector<8x8xf32>
    %34 = arith.truncf %33 : vector<8x8xf32> to vector<8x8xbf16>
    %c0_12 = arith.constant 0 : index
    %c0_13 = arith.constant 0 : index
    %35 = vector.load %arg4[%c0_12, %c0_13] : memref<32x32xbf16, #tpu.memory_space<vmem>>, vector<8x32xbf16>
    %cst_14 = arith.constant dense<0.000000e+00> : vector<8x32xf32>
    %36 = tpu.matmul %34, %35, %cst_14 {dimension_numbers = #tpu.dot_dimension_numbers<[1], [0], [0], [1], [0, 0, 1, 1], [], []>} : vector<8x8xbf16>, vector<8x32xbf16>, vector<8x32xf32> -> vector<8x32xf32>
    %37 = arith.addf %16, %36 : vector<8x32xf32>
    %38 = vector.extract_strided_slice %11 {offsets = [0, 8], sizes = [8, 8], strides = [1, 1]} : vector<8x32xbf16> to vector<8x8xbf16>
    %39 = vector.extract_strided_slice %13 {offsets = [0, 8], sizes = [8, 8], strides = [1, 1]} : vector<8x32xbf16> to vector<8x8xbf16>
    %40 = vector.extract_strided_slice %15 {offsets = [0, 8], sizes = [8, 8], strides = [1, 1]} : vector<8x32xbf16> to vector<8x8xbf16>
    %41 = tpu.transpose %39, [1, 0] : vector<8x8xbf16> -> vector<8x8xbf16>
    %cst_15 = arith.constant dense<0.000000e+00> : vector<8x8xf32>
    %42 = tpu.matmul %38, %41, %cst_15 {dimension_numbers = #tpu.dot_dimension_numbers<[1], [0], [0], [1], [0, 0, 1, 1], [], []>} : vector<8x8xbf16>, vector<8x8xbf16>, vector<8x8xf32> -> vector<8x8xf32>
    %cst_16 = arith.constant dense<0xFF800000> : vector<8xf32>
    %43 = vector.multi_reduction <maximumf>, %42, %cst_16 [1] : vector<8x8xf32> to vector<8xf32>
    %44 = vector.shape_cast %43 : vector<8xf32> to vector<8x1xf32>
    %45 = vector.broadcast %44 : vector<8x1xf32> to vector<8x8xf32>
    %46 = arith.subf %42, %45 : vector<8x8xf32>
    %47 = math.exp %46 : vector<8x8xf32>
    %cst_17 = arith.constant dense<0.000000e+00> : vector<8xf32>
    %48 = vector.multi_reduction <add>, %47, %cst_17 [1] : vector<8x8xf32> to vector<8xf32>
    %49 = vector.shape_cast %48 : vector<8xf32> to vector<8x1xf32>
    %50 = arith.truncf %47 : vector<8x8xf32> to vector<8x8xbf16>
    %cst_18 = arith.constant dense<0.000000e+00> : vector<8x8xf32>
    %51 = tpu.matmul %50, %40, %cst_18 {dimension_numbers = #tpu.dot_dimension_numbers<[1], [0], [0], [1], [0, 0, 1, 1], [], []>} : vector<8x8xbf16>, vector<8x8xbf16>, vector<8x8xf32> -> vector<8x8xf32>
    %52 = tpu.reciprocal %49 {approx = true} : vector<8x1xf32> -> vector<8x1xf32>
    %53 = vector.broadcast %52 : vector<8x1xf32> to vector<8x8xf32>
    %54 = arith.mulf %51, %53 : vector<8x8xf32>
    %55 = arith.truncf %54 : vector<8x8xf32> to vector<8x8xbf16>
    %c8 = arith.constant 8 : index
    %c0_19 = arith.constant 0 : index
    %56 = vector.load %arg4[%c8, %c0_19] : memref<32x32xbf16, #tpu.memory_space<vmem>>, vector<8x32xbf16>
    %cst_20 = arith.constant dense<0.000000e+00> : vector<8x32xf32>
    %57 = tpu.matmul %55, %56, %cst_20 {dimension_numbers = #tpu.dot_dimension_numbers<[1], [0], [0], [1], [0, 0, 1, 1], [], []>} : vector<8x8xbf16>, vector<8x32xbf16>, vector<8x32xf32> -> vector<8x32xf32>
    %58 = arith.addf %37, %57 : vector<8x32xf32>
    %59 = vector.extract_strided_slice %11 {offsets = [0, 16], sizes = [8, 8], strides = [1, 1]} : vector<8x32xbf16> to vector<8x8xbf16>
    %60 = vector.extract_strided_slice %13 {offsets = [0, 16], sizes = [8, 8], strides = [1, 1]} : vector<8x32xbf16> to vector<8x8xbf16>
    %61 = vector.extract_strided_slice %15 {offsets = [0, 16], sizes = [8, 8], strides = [1, 1]} : vector<8x32xbf16> to vector<8x8xbf16>
    %62 = tpu.transpose %60, [1, 0] : vector<8x8xbf16> -> vector<8x8xbf16>
    %cst_21 = arith.constant dense<0.000000e+00> : vector<8x8xf32>
    %63 = tpu.matmul %59, %62, %cst_21 {dimension_numbers = #tpu.dot_dimension_numbers<[1], [0], [0], [1], [0, 0, 1, 1], [], []>} : vector<8x8xbf16>, vector<8x8xbf16>, vector<8x8xf32> -> vector<8x8xf32>
    %cst_22 = arith.constant dense<0xFF800000> : vector<8xf32>
    %64 = vector.multi_reduction <maximumf>, %63, %cst_22 [1] : vector<8x8xf32> to vector<8xf32>
    %65 = vector.shape_cast %64 : vector<8xf32> to vector<8x1xf32>
    %66 = vector.broadcast %65 : vector<8x1xf32> to vector<8x8xf32>
    %67 = arith.subf %63, %66 : vector<8x8xf32>
    %68 = math.exp %67 : vector<8x8xf32>
    %cst_23 = arith.constant dense<0.000000e+00> : vector<8xf32>
    %69 = vector.multi_reduction <add>, %68, %cst_23 [1] : vector<8x8xf32> to vector<8xf32>
    %70 = vector.shape_cast %69 : vector<8xf32> to vector<8x1xf32>
    %71 = arith.truncf %68 : vector<8x8xf32> to vector<8x8xbf16>
    %cst_24 = arith.constant dense<0.000000e+00> : vector<8x8xf32>
    %72 = tpu.matmul %71, %61, %cst_24 {dimension_numbers = #tpu.dot_dimension_numbers<[1], [0], [0], [1], [0, 0, 1, 1], [], []>} : vector<8x8xbf16>, vector<8x8xbf16>, vector<8x8xf32> -> vector<8x8xf32>
    %73 = tpu.reciprocal %70 {approx = true} : vector<8x1xf32> -> vector<8x1xf32>
    %74 = vector.broadcast %73 : vector<8x1xf32> to vector<8x8xf32>
    %75 = arith.mulf %72, %74 : vector<8x8xf32>
    %76 = arith.truncf %75 : vector<8x8xf32> to vector<8x8xbf16>
    %c16 = arith.constant 16 : index
    %c0_25 = arith.constant 0 : index
    %77 = vector.load %arg4[%c16, %c0_25] : memref<32x32xbf16, #tpu.memory_space<vmem>>, vector<8x32xbf16>
    %cst_26 = arith.constant dense<0.000000e+00> : vector<8x32xf32>
    %78 = tpu.matmul %76, %77, %cst_26 {dimension_numbers = #tpu.dot_dimension_numbers<[1], [0], [0], [1], [0, 0, 1, 1], [], []>} : vector<8x8xbf16>, vector<8x32xbf16>, vector<8x32xf32> -> vector<8x32xf32>
    %79 = arith.addf %58, %78 : vector<8x32xf32>
    %80 = vector.extract_strided_slice %11 {offsets = [0, 24], sizes = [8, 8], strides = [1, 1]} : vector<8x32xbf16> to vector<8x8xbf16>
    %81 = vector.extract_strided_slice %13 {offsets = [0, 24], sizes = [8, 8], strides = [1, 1]} : vector<8x32xbf16> to vector<8x8xbf16>
    %82 = vector.extract_strided_slice %15 {offsets = [0, 24], sizes = [8, 8], strides = [1, 1]} : vector<8x32xbf16> to vector<8x8xbf16>
    %83 = tpu.transpose %81, [1, 0] : vector<8x8xbf16> -> vector<8x8xbf16>
    %cst_27 = arith.constant dense<0.000000e+00> : vector<8x8xf32>
    %84 = tpu.matmul %80, %83, %cst_27 {dimension_numbers = #tpu.dot_dimension_numbers<[1], [0], [0], [1], [0, 0, 1, 1], [], []>} : vector<8x8xbf16>, vector<8x8xbf16>, vector<8x8xf32> -> vector<8x8xf32>
    %cst_28 = arith.constant dense<0xFF800000> : vector<8xf32>
    %85 = vector.multi_reduction <maximumf>, %84, %cst_28 [1] : vector<8x8xf32> to vector<8xf32>
    %86 = vector.shape_cast %85 : vector<8xf32> to vector<8x1xf32>
    %87 = vector.broadcast %86 : vector<8x1xf32> to vector<8x8xf32>
    %88 = arith.subf %84, %87 : vector<8x8xf32>
    %89 = math.exp %88 : vector<8x8xf32>
    %cst_29 = arith.constant dense<0.000000e+00> : vector<8xf32>
    %90 = vector.multi_reduction <add>, %89, %cst_29 [1] : vector<8x8xf32> to vector<8xf32>
    %91 = vector.shape_cast %90 : vector<8xf32> to vector<8x1xf32>
    %92 = arith.truncf %89 : vector<8x8xf32> to vector<8x8xbf16>
    %cst_30 = arith.constant dense<0.000000e+00> : vector<8x8xf32>
    %93 = tpu.matmul %92, %82, %cst_30 {dimension_numbers = #tpu.dot_dimension_numbers<[1], [0], [0], [1], [0, 0, 1, 1], [], []>} : vector<8x8xbf16>, vector<8x8xbf16>, vector<8x8xf32> -> vector<8x8xf32>
    %94 = tpu.reciprocal %91 {approx = true} : vector<8x1xf32> -> vector<8x1xf32>
    %95 = vector.broadcast %94 : vector<8x1xf32> to vector<8x8xf32>
    %96 = arith.mulf %93, %95 : vector<8x8xf32>
    %97 = arith.truncf %96 : vector<8x8xf32> to vector<8x8xbf16>
    %c24 = arith.constant 24 : index
    %c0_31 = arith.constant 0 : index
    %98 = vector.load %arg4[%c24, %c0_31] : memref<32x32xbf16, #tpu.memory_space<vmem>>, vector<8x32xbf16>
    %cst_32 = arith.constant dense<0.000000e+00> : vector<8x32xf32>
    %99 = tpu.matmul %97, %98, %cst_32 {dimension_numbers = #tpu.dot_dimension_numbers<[1], [0], [0], [1], [0, 0, 1, 1], [], []>} : vector<8x8xbf16>, vector<8x32xbf16>, vector<8x32xf32> -> vector<8x32xf32>
    %100 = arith.addf %79, %99 : vector<8x32xf32>
    %c0_33 = arith.constant 0 : index
    %c0_34 = arith.constant 0 : index
    %101 = vector.load %arg5[%c0_33, %c0_34] : memref<1x32xf32, #tpu.memory_space<vmem>>, vector<1x32xf32>
    %102 = vector.broadcast %101 : vector<1x32xf32> to vector<8x32xf32>
    %103 = arith.addf %100, %102 : vector<8x32xf32>
    %104 = arith.addf %1, %103 : vector<8x32xf32>
    %c0_35 = arith.constant 0 : index
    %c0_36 = arith.constant 0 : index
    %105 = vector.load %arg6[%c0_35, %c0_36] : memref<1x32xf32, #tpu.memory_space<vmem>>, vector<1x32xf32>
    %c0_37 = arith.constant 0 : index
    %c0_38 = arith.constant 0 : index
    %106 = vector.load %arg7[%c0_37, %c0_38] : memref<1x32xf32, #tpu.memory_space<vmem>>, vector<1x32xf32>
    %cst_39 = arith.constant dense<0.000000e+00> : vector<8xf32>
    %107 = vector.multi_reduction <add>, %104, %cst_39 [1] : vector<8x32xf32> to vector<8xf32>
    %108 = vector.shape_cast %107 : vector<8xf32> to vector<8x1xf32>
    %cst_40 = arith.constant 3.200000e+01 : f32
    %109 = vector.broadcast %cst_40 : f32 to vector<8x1xf32>
    %110 = arith.divf %108, %109 : vector<8x1xf32>
    %111 = vector.broadcast %110 : vector<8x1xf32> to vector<8x32xf32>
    %112 = arith.subf %104, %111 : vector<8x32xf32>
    %113 = arith.mulf %112, %112 : vector<8x32xf32>
    %cst_41 = arith.constant dense<0.000000e+00> : vector<8xf32>
    %114 = vector.multi_reduction <add>, %113, %cst_41 [1] : vector<8x32xf32> to vector<8xf32>
    %115 = vector.shape_cast %114 : vector<8xf32> to vector<8x1xf32>
    %cst_42 = arith.constant 3.200000e+01 : f32
    %116 = vector.broadcast %cst_42 : f32 to vector<8x1xf32>
    %117 = arith.divf %115, %116 : vector<8x1xf32>
    %118 = vector.broadcast %110 : vector<8x1xf32> to vector<8x32xf32>
    %119 = arith.subf %104, %118 : vector<8x32xf32>
    %cst_43 = arith.constant 9.99999974E-6 : f32
    %120 = vector.broadcast %cst_43 : f32 to vector<8x1xf32>
    %121 = arith.addf %117, %120 : vector<8x1xf32>
    %122 = math.rsqrt %121 : vector<8x1xf32>
    %123 = vector.broadcast %122 : vector<8x1xf32> to vector<8x32xf32>
    %124 = arith.mulf %119, %123 : vector<8x32xf32>
    %125 = vector.broadcast %105 : vector<1x32xf32> to vector<8x32xf32>
    %126 = arith.mulf %124, %125 : vector<8x32xf32>
    %127 = vector.broadcast %106 : vector<1x32xf32> to vector<8x32xf32>
    %128 = arith.addf %126, %127 : vector<8x32xf32>
    %129 = arith.truncf %128 : vector<8x32xf32> to vector<8x32xbf16>
    %c0_44 = arith.constant 0 : index
    %c0_45 = arith.constant 0 : index
    %130 = vector.load %arg8[%c0_44, %c0_45] : memref<32x128xbf16, #tpu.memory_space<vmem>>, vector<32x128xbf16>
    %cst_46 = arith.constant dense<0.000000e+00> : vector<8x128xf32>
    %131 = tpu.matmul %129, %130, %cst_46 {dimension_numbers = #tpu.dot_dimension_numbers<[1], [0], [0], [1], [0, 0, 1, 1], [], []>} : vector<8x32xbf16>, vector<32x128xbf16>, vector<8x128xf32> -> vector<8x128xf32>
    %c0_47 = arith.constant 0 : index
    %c0_48 = arith.constant 0 : index
    %132 = vector.load %arg9[%c0_47, %c0_48] : memref<1x128xf32, #tpu.memory_space<vmem>>, vector<1x128xf32>
    %133 = vector.broadcast %132 : vector<1x128xf32> to vector<8x128xf32>
    %134 = arith.addf %131, %133 : vector<8x128xf32>
    %cst_49 = arith.constant 5.000000e-01 : f32
    %135 = vector.broadcast %cst_49 : f32 to vector<8x128xf32>
    %136 = arith.mulf %135, %134 : vector<8x128xf32>
    %cst_50 = arith.constant 0.707106769 : f32
    %137 = vector.broadcast %cst_50 : f32 to vector<8x128xf32>
    %138 = arith.mulf %134, %137 : vector<8x128xf32>
    %139 = math.erf %138 : vector<8x128xf32>
    %cst_51 = arith.constant 1.000000e+00 : f32
    %140 = vector.broadcast %cst_51 : f32 to vector<8x128xf32>
    %141 = arith.addf %140, %139 : vector<8x128xf32>
    %142 = arith.mulf %136, %141 : vector<8x128xf32>
    %143 = arith.truncf %142 : vector<8x128xf32> to vector<8x128xbf16>
    %c0_52 = arith.constant 0 : index
    %c0_53 = arith.constant 0 : index
    %144 = vector.load %arg10[%c0_52, %c0_53] : memref<128x32xbf16, #tpu.memory_space<vmem>>, vector<128x32xbf16>
    %cst_54 = arith.constant dense<0.000000e+00> : vector<8x32xf32>
    %145 = tpu.matmul %143, %144, %cst_54 {dimension_numbers = #tpu.dot_dimension_numbers<[1], [0], [0], [1], [0, 0, 1, 1], [], []>} : vector<8x128xbf16>, vector<128x32xbf16>, vector<8x32xf32> -> vector<8x32xf32>
    %c0_55 = arith.constant 0 : index
    %c0_56 = arith.constant 0 : index
    %146 = vector.load %arg11[%c0_55, %c0_56] : memref<1x32xf32, #tpu.memory_space<vmem>>, vector<1x32xf32>
    %147 = vector.broadcast %146 : vector<1x32xf32> to vector<8x32xf32>
    %148 = arith.addf %145, %147 : vector<8x32xf32>
    %149 = arith.addf %128, %148 : vector<8x32xf32>
    %c0_57 = arith.constant 0 : index
    %c0_58 = arith.constant 0 : index
    %150 = vector.load %arg12[%c0_57, %c0_58] : memref<1x32xf32, #tpu.memory_space<vmem>>, vector<1x32xf32>
    %c0_59 = arith.constant 0 : index
    %c0_60 = arith.constant 0 : index
    %151 = vector.load %arg13[%c0_59, %c0_60] : memref<1x32xf32, #tpu.memory_space<vmem>>, vector<1x32xf32>
    %cst_61 = arith.constant dense<0.000000e+00> : vector<8xf32>
    %152 = vector.multi_reduction <add>, %149, %cst_61 [1] : vector<8x32xf32> to vector<8xf32>
    %153 = vector.shape_cast %152 : vector<8xf32> to vector<8x1xf32>
    %cst_62 = arith.constant 3.200000e+01 : f32
    %154 = vector.broadcast %cst_62 : f32 to vector<8x1xf32>
    %155 = arith.divf %153, %154 : vector<8x1xf32>
    %156 = vector.broadcast %155 : vector<8x1xf32> to vector<8x32xf32>
    %157 = arith.subf %149, %156 : vector<8x32xf32>
    %158 = arith.mulf %157, %157 : vector<8x32xf32>
    %cst_63 = arith.constant dense<0.000000e+00> : vector<8xf32>
    %159 = vector.multi_reduction <add>, %158, %cst_63 [1] : vector<8x32xf32> to vector<8xf32>
    %160 = vector.shape_cast %159 : vector<8xf32> to vector<8x1xf32>
    %cst_64 = arith.constant 3.200000e+01 : f32
    %161 = vector.broadcast %cst_64 : f32 to vector<8x1xf32>
    %162 = arith.divf %160, %161 : vector<8x1xf32>
    %163 = vector.broadcast %155 : vector<8x1xf32> to vector<8x32xf32>
    %164 = arith.subf %149, %163 : vector<8x32xf32>
    %cst_65 = arith.constant 9.99999974E-6 : f32
    %165 = vector.broadcast %cst_65 : f32 to vector<8x1xf32>
    %166 = arith.addf %162, %165 : vector<8x1xf32>
    %167 = math.rsqrt %166 : vector<8x1xf32>
    %168 = vector.broadcast %167 : vector<8x1xf32> to vector<8x32xf32>
    %169 = arith.mulf %164, %168 : vector<8x32xf32>
    %170 = vector.broadcast %150 : vector<1x32xf32> to vector<8x32xf32>
    %171 = arith.mulf %169, %170 : vector<8x32xf32>
    %172 = vector.broadcast %151 : vector<1x32xf32> to vector<8x32xf32>
    %173 = arith.addf %171, %172 : vector<8x32xf32>
    %c0_66 = arith.constant 0 : index
    %c0_67 = arith.constant 0 : index
    %c0_68 = arith.constant 0 : index
    %174 = vector.load %arg14[%c0_66, %c0_67, %c0_68] : memref<1x8x32xf32, #tpu.memory_space<vmem>>, vector<1x8x32xf32>
    %175 = vector.shape_cast %174 : vector<1x8x32xf32> to vector<8x32xf32>
    %176 = vector.shape_cast %173 : vector<8x32xf32> to vector<1x8x32xf32>
    tpu.vector_store %arg14[%c0_66, %c0_67, %c0_68], %176 {strides = array<i32>} : memref<1x8x32xf32, #tpu.memory_space<vmem>>, vector<1x8x32xf32>,
    return
  }
  func.func @transform_0(%arg0: i32) -> (i32, i32, i32) {
    %c0_i32 = arith.constant 0 : i32
    %c0_i32_0 = arith.constant 0 : i32
    %c0_i32_1 = arith.constant 0 : i32
    return %arg0, %c0_i32, %c0_i32_0 : i32, i32, i32
  }
  func.func @transform_1(%arg0: i32) -> (i32, i32) {
    %c0_i32 = arith.constant 0 : i32
    %c0_i32_0 = arith.constant 0 : i32
    %c0_i32_1 = arith.constant 0 : i32
    return %c0_i32, %c0_i32_0 : i32, i32
  }
  func.func @transform_2(%arg0: i32) -> (i32, i32) {
    %c0_i32 = arith.constant 0 : i32
    %c0_i32_0 = arith.constant 0 : i32
    %c0_i32_1 = arith.constant 0 : i32
    return %c0_i32, %c0_i32_0 : i32, i32
  }
  func.func @transform_3(%arg0: i32) -> (i32, i32) {
    %c0_i32 = arith.constant 0 : i32
    %c0_i32_0 = arith.constant 0 : i32
    %c0_i32_1 = arith.constant 0 : i32
    return %c0_i32, %c0_i32_0 : i32, i32
  }
  func.func @transform_4(%arg0: i32) -> (i32, i32) {
    %c0_i32 = arith.constant 0 : i32
    %c0_i32_0 = arith.constant 0 : i32
    %c0_i32_1 = arith.constant 0 : i32
    return %c0_i32, %c0_i32_0 : i32, i32
  }
  func.func @transform_5(%arg0: i32) -> (i32, i32) {
    %c0_i32 = arith.constant 0 : i32
    %c0_i32_0 = arith.constant 0 : i32
    %c0_i32_1 = arith.constant 0 : i32
    return %c0_i32, %c0_i32_0 : i32, i32
  }
  func.func @transform_6(%arg0: i32) -> (i32, i32) {
    %c0_i32 = arith.constant 0 : i32
    %c0_i32_0 = arith.constant 0 : i32
    %c0_i32_1 = arith.constant 0 : i32
    return %c0_i32, %c0_i32_0 : i32, i32
  }
  func.func @transform_7(%arg0: i32) -> (i32, i32) {
    %c0_i32 = arith.constant 0 : i32
    %c0_i32_0 = arith.constant 0 : i32
    %c0_i32_1 = arith.constant 0 : i32
    return %c0_i32, %c0_i32_0 : i32, i32
  }
  func.func @transform_8(%arg0: i32) -> (i32, i32) {
    %c0_i32 = arith.constant 0 : i32
    %c0_i32_0 = arith.constant 0 : i32
    %c0_i32_1 = arith.constant 0 : i32
    return %c0_i32, %c0_i32_0 : i32, i32
  }
  func.func @transform_9(%arg0: i32) -> (i32, i32) {
    %c0_i32 = arith.constant 0 : i32
    %c0_i32_0 = arith.constant 0 : i32
    %c0_i32_1 = arith.constant 0 : i32
    return %c0_i32, %c0_i32_0 : i32, i32
  }
  func.func @transform_10(%arg0: i32) -> (i32, i32) {
    %c0_i32 = arith.constant 0 : i32
    %c0_i32_0 = arith.constant 0 : i32
    %c0_i32_1 = arith.constant 0 : i32
    return %c0_i32, %c0_i32_0 : i32, i32
  }
  func.func @transform_11(%arg0: i32) -> (i32, i32) {
    %c0_i32 = arith.constant 0 : i32
    %c0_i32_0 = arith.constant 0 : i32
    %c0_i32_1 = arith.constant 0 : i32
    return %c0_i32, %c0_i32_0 : i32, i32
  }
  func.func @transform_12(%arg0: i32) -> (i32, i32) {
    %c0_i32 = arith.constant 0 : i32
    %c0_i32_0 = arith.constant 0 : i32
    %c0_i32_1 = arith.constant 0 : i32
    return %c0_i32, %c0_i32_0 : i32, i32
  }
  func.func @transform_13(%arg0: i32) -> (i32, i32, i32) {
    %c0_i32 = arith.constant 0 : i32
    %c0_i32_0 = arith.constant 0 : i32
    %c0_i32_1 = arith.constant 0 : i32
    return %arg0, %c0_i32, %c0_i32_0 : i32, i32, i32
  }
}

</mosaic_0001>

<bundles_post_ra>
// kernel: tpu_custom_call.1
= control target key start
LH: loop header
LB: loop body
LE: loop exit
PB: predicated region body
PF: predicated region fallthrough
CT: control target
= control target key end

     0   :  { %s2180_s0 = inlined_call_operand.vmem [shape: f32[2,8,32], index: 0, kind: input, shape index: {}]   ;;  %s2181_s1 = inlined_call_operand.vmem [shape: bf16[32,96], index: 1, kind: input, shape index: {}]   ;;  %s2182_s2 = inlined_call_operand.vmem [shape: f32[1,96], index: 2, kind: input, shape index: {}]   ;;  %s2183_s3 = inlined_call_operand.vmem [shape: bf16[32,32], index: 3, kind: input, shape index: {}]   ;;  %s2184_s4 = inlined_call_operand.vmem [shape: f32[1,32], index: 4, kind: input, shape index: {}]   ;;  %s2185_s5 = inlined_call_operand.vmem [shape: f32[1,32], index: 5, kind: input, shape index: {}]   ;;  %s2186_s6 = inlined_call_operand.vmem [shape: f32[1,32], index: 6, kind: input, shape index: {}]   ;;  %s2187_s7 = inlined_call_operand.vmem [shape: bf16[32,128], index: 7, kind: input, shape index: {}]   ;;  %s2188_s8 = inlined_call_operand.vmem [shape: f32[1,128], index: 8, kind: input, shape index: {}]   ;;  %s2189_s9 = inlined_call_operand.vmem [shape: bf16[128,32], index: 9, kind: input, shape index: {}]   ;;  %s2190_s10 = inlined_call_operand.vmem [shape: f32[1,32], index: 10, kind: input, shape index: {}]   ;;  %s2191_s11 = inlined_call_operand.vmem [shape: f32[1,32], index: 11, kind: input, shape index: {}]   ;;  %s2192_s12 = inlined_call_operand.vmem [shape: f32[1,32], index: 12, kind: input, shape index: {}]   ;;  %s2193_s13 = inlined_call_operand.hbm [shape: f32[2,8,32], index: 13, kind: output, shape index: {}]  }
   0x1   :  { %2194 = sst [smem:[#allocation5_spill]] %s2180_s0 }
   0x2   :  { %2195 = sst [smem:[#allocation6_spill]] %s2181_s1 }
   0x3   :  { %2196 = sst [smem:[#allocation7_spill]] %s2182_s2 }
   0x4   :  { %2197 = sst [smem:[#allocation8_spill]] %s2183_s3 }
   0x5   :  { %18 = vsyncpa [#allocation3], 0 }
   0x6   :  { %20 = vsyncpa [#allocation3 + $0x1], 0  ;;  %s1897_s25 = smov 0   ;;  %s1899_s26 = smov 0  }
   0x7   :  { %s1901_s27 = smov 0   ;;  %s1903_s28 = smov 0  }
   0x8 LB: > { %s1918_s29 = sadd.s32 4294967295, %s1811_s28   ;;  %s1472_s30 = sadd.s32 4294967294, %s1811_s28   ;;  %s1811_s28 = sphi %s1903_s28, %s2207_s28   ;;  %s1807_s27 = sphi %s1901_s27, %s2206_s27   ;;  %s1803_s26 = sphi %s1899_s26, %s2205_s26   ;;  %s1799_s25 = sphi %s1897_s25, %s2204_s25  }
   0x9   : > { %s1922_s14 = sadd.s32 1, %s1811_s28   ;;  %s311_s15 = sadd.s32 1, %s1807_s27 }
   0xa   : > { %s308_s16 = ssub.s32 %s1811_s28, %s1922_s14  ;;  %p321_p0 = scmp.ne.s32.totalorder %s1807_s27, %s1803_s26 }
   0xb   : > { %p309_p1 = scmp.eq.s32.totalorder %s308_s16, 0  ;;  %p322_p2 = scmp.eq.s32.totalorder %s1918_s29, 1 }
   0xc   : > { %p327_p3 = scmp.ne.s32.totalorder %s1803_s26, %s1799_s25  ;;  %p328_p4 = scmp.eq.s32.totalorder %s1472_s30, 1 }
   0xd   : > { %s1933_s17 = scalar_select %p309_p1, %s1807_s27, %s311_s15  }
   0xe   : > { %p1935_p5 = por %p322_p2, %p321_p0  ;;  %p1939_p6 = por %p328_p4, %p327_p3 }
   0xf   : > { %p1475_p7 = scmp.ge.s32.totalorder %s1811_s28, 1  ;;  %p389_p8 = scmp.lt.s32.totalorder %s1811_s28, 3 }
  0x11   : > { %p390_p9 = pnand %p1475_p7, %p389_p8 }
  0x12   : > { %s2200_s1 = sld [smem:[#allocation6_spill]] (!%p390_p9)  ;;  %v1813_v1 = vmov (!%p390_p9), 0.0   ;;  %vm1814_vm0 = vmmov (!%p390_p9), 0   ;;  %p432_p10 = scmp.lt.s32.totalorder (!%p390_p9), %s1918_s29, 1  ;;  %vm462_vm1 = vcmask (!%p390_p9), 261120   ;;  %vm512_vm2 = vcmask (!%p390_p9), 64512  }
  0x13   : > { %393 = sbr.rel (%p390_p9) target bundleno = 3625 (0xe29), region = 72  ;;  %1555 = vmatprep.subr.bf16.mxu1 (!%p390_p9), %v1813_v1  ;;  %1581 = vmatprep.subr.bf16.mxu0 (!%p390_p9), %v1813_v1  ;;  %s2201_s0 = sld [smem:[#allocation5_spill]] (!%p390_p9)  ;;  %vm574_vm3 = vcmask (!%p390_p9), 1043456  }
  0x14   : > { %1559 = vmatprep.mubr.msk.bf16.mxu1 (!%p390_p9), %vm1814_vm0, %v1813_v1  ;;  %1583 = vmatprep.mubr.msk.bf16.mxu0 (!%p390_p9), %vm1814_vm0, %v1813_v1  ;;  %s2202_s2 = sld [smem:[#allocation7_spill]] (!%p390_p9)  ;;  %s1815_s23 = smov (!%p390_p9), 64  }
  0x15   : > { %s1818_s15 = smov (!%p390_p9), 120   ;;  %s1819_s16 = smov (!%p390_p9), 56  }
  0x16   : > { %s1821_s21 = smov (!%p390_p9), 48   ;;  %s1822_s22 = smov (!%p390_p9), 104  }
  0x17   : > { %s2203_s3 = sld [smem:[#allocation8_spill]] (!%p390_p9) }
  0x18   : > { %v1715_v0 = vld [vmem:[%s2200_s1] sm:$0xff] (!%p390_p9)   ;;  %v1716_v2 = vld [vmem:[%s2200_s1 + $0x8] sm:$0xff] (!%p390_p9)  }
  0x19   : > { %1556 = vmatpush3.bf16.msra.mxu1 (!%p390_p9), %v1715_v0 }
  0x1a   : > { %1557 = vmatprep.subr.bf16.mxu1 %v1813_v1  ;;  %s433_s24 = scalar_select %p432_p10, %s1918_s29, 1  ;;  %v1478_v5 = vld [vmem:[%s2202_s2] ss:$0 sm:$0xff] }
  0x1c   : > { %s1477_s30 = sshll.u32 %s433_s24, 3  ;;  %s1816_s24 = smov 96  }
  0x1d   : > { %1558 = vmatpush3.bf16.msra.mxu1 %v1716_v2  ;;  %s435_s20 = scalar_lea.vmem %s2201_s0, %s1477_s30  ;;  %s1817_s30 = smov 88   ;;  %v621_v48 = vld [vmem:[%s2203_s3] sm:$0xf]  ;;  %v734_v58 = vld [vmem:[%s2203_s3 + $0x4] sm:$0xf] }
  0x1e   : > { %1563 = vmatprep.subr.bf16.mxu1 %v1813_v1  ;;  %v1964_v3 = vld [vmem:[%s435_s20] sm:$0xff]  ;;  %s1820_s20 = smov 112   ;;  %v785_v52 = vsel %vm574_vm3, %v621_v48, 0  ;;  %v739_v59 = vsel %vm574_vm3, %v734_v58, 0 }
  0x1f   : > { %v438_v4 = vpack.c.bf16 %v1964_v3, %v1964_v3 }
  0x21   : > { %1560 = vmatmul.mubr.msk.bf16.vlgmr.msra.gmra.mrb[0].mxu1 %vm462_vm1, %v438_v4 }
  0x22   : > { %1565 = vmatprep.mubr.msk.bf16.mxu1 %vm1814_vm0, %v1813_v1 }
  0xf4   : > { %v500_v6 = vpop.f32.mrb[0].mxu1 }
  0xf5   : > { %v501_v7 = vadd.f32 %v1478_v5, %v500_v6  ;;  %v1561_v8 = vpop.f32.mrb[1].mxu1 }
  0xf6   : > { %v503_v9 = vpop.f32.mrb[2].mxu1 }
  0xf7   : > { %v1974_v10 = vpack.c.bf16 %v501_v7, %v501_v7  ;;  %v1562_v11 = vpop.f32.mrb[3].mxu1  ;;  %v506_v12 = vmul.f32 0.35355338, %v501_v7 }
  0xf9   : > { %569 = vrot.lane.b32.xlu1 %v1974_v10, %s1815_s23  ;;  %510 = vrot.lane.b32.xlu0 %v1974_v10, %s1816_s24  ;;  %v507_v13 = vpack.c.bf16 %v506_v12, %v506_v12  ;;  %s429_s24 = sand.u32 1, %s1803_s26  }
  0xfd   : > { %625 = vrot.lane.b32.xlu1 %v1974_v10, %s1817_s30  ;;  %s1823_s30 = smov 80  }
 0x101   : > { %623 = vrot.lane.b32.xlu1 %v507_v13, %s1818_s15  ;;  %s1400_s15 = scalar_lea.sflag [#allocation3], %s429_s24 }
 0x16b   : > { %v511_v14 = vpop.permute.xlu0 %510  ;;  %v570_v16 = vpop.permute.xlu1 %569 }
 0x16c   : > { %v517_v15 = vsel %vm512_vm2, %v511_v14, 0  ;;  %v576_v17 = vsel %vm574_vm3, %v570_v16, 0 }
 0x16d   : > { %1564 = vmatpush3.bf16.xpose.msra.mxu1 %v517_v15 }
 0x16e   : > { %1569 = vmatprep.subr.bf16.mxu1 %v1813_v1 }
 0x16f   : > { %v626_v29 = vpop.permute.xlu1 %625 }
 0x170   : > { %v631_v32 = vsel %vm512_vm2, %v626_v29, 0 }
 0x173   : > { %v624_v33 = vpop.permute.xlu1 %623 }
 0x174   : > { %1566 = vmatmul.mubr.msk.bf16.vlgmr.msra.gmra.mrb[4].mxu1 %vm512_vm2, %v507_v13 }
 0x175   : > { %1570 = vmatpush3.bf16.msra.mxu1 %v576_v17  ;;  %1571 = vmatprep.mubr.msk.bf16.mxu1 %vm1814_vm0, %v1813_v1 }
 0x176   : > { %1575 = vmatprep.subr.bf16.mxu1 %v1813_v1 }
 0x247   : > { %v553_v18 = vpop.f32.mrb[4].mxu1 }
 0x248   : > { %v1567_v19 = vpop.f32.mrb[5].mxu1  ;;  %v559_v20 = vsel %vm512_vm2, %v553_v18, -inf }
 0x249   : > { %560 = vmax.xlane.f32.xlu0 %v559_v20  ;;  %v556_v21 = vpop.f32.mrb[6].mxu1 }
 0x24a   : > { %v1568_v22 = vpop.f32.mrb[7].mxu1 }
 0x25f   : > { %683 = vrot.lane.b32.xlu0 %v1974_v10, %s1819_s16 }
 0x263   : > { %827 = vrot.lane.b32.xlu0 %v507_v13, %s1820_s20  ;;  %s1824_s20 = smov 72  }
 0x2d6   : > { %v561_v23 = vpop.xlane.xlu0 %560 }
 0x2d7   : > { %v562_v24 = vsub.f32 %v553_v18, %v561_v23 }
 0x2d9   : > { %v563_v25 = vmul.f32 1.442695, %v562_v24 }
 0x2da   : > { %v684_v26 = vpop.permute.xlu0 %683 }
 0x2db   : > { %1727 = vpow2.f32 %v563_v25  ;;  %v689_v27 = vsel %vm574_vm3, %v684_v26, 0 }
 0x2dc   : > { %1582 = vmatpush3.bf16.msra.mxu0 %v689_v27 }
 0x2dd   : > { %1593 = vmatprep.subr.bf16.mxu0 %v1813_v1 }
 0x2de   : > { %v828_v45 = vpop.permute.xlu0 %827 }
 0x2e5   : > { %v1728_v28 = vpop.eup %1727 }
 0x2e6   : > { %v565_v30 = vsel %vm512_vm2, %v1728_v28, 0.0  ;;  %v568_v31 = vpack.c.bf16 %v1728_v28, %v1728_v28 }
 0x2e7   : > { %566 = vadd.xlane.f32.xlu0 %v565_v30 }
 0x2e8   : > { %1572 = vmatmul.mubr.msk.bf16.vlgmr.msra.gmra.mrb[8].mxu1 %vm512_vm2, %v568_v31 }
 0x2e9   : > { %1576 = vmatpush3.bf16.xpose.msra.mxu1 %v631_v32  ;;  %1577 = vmatprep.mubr.msk.bf16.mxu1 %vm1814_vm0, %v1813_v1  ;;  %v938_v32 = vld [vmem:[%s2203_s3 + $0x8] sm:$0xf] }
 0x2ea   : > { %1587 = vmatprep.subr.bf16.mxu1 %v1813_v1 }
 0x2f0   : > { %1578 = vmatmul.mubr.msk.bf16.vlgmr.msra.gmra.mrb[12].mxu1 %vm512_vm2, %v624_v33  ;;  %v943_v33 = vsel %vm574_vm3, %v938_v32, 0  ;;  %v1496_v32 = vld [vmem:[%s2186_s6] ss:$0 sm:$0xff] }
 0x2f1   : > { %1589 = vmatprep.mubr.msk.bf16.mxu1 %vm1814_vm0, %v1813_v1  ;;  %1588 = vmatpush3.bf16.msra.mxu1 %v739_v59 }
 0x2f2   : > { %1599 = vmatprep.subr.bf16.mxu1 %v1813_v1 }
 0x2fd   : > { %887 = vrot.lane.b32.xlu0 %v1974_v10, %s1821_s21  ;;  %s1825_s21 = smov 40  }
 0x301   : > { %986 = vrot.lane.b32.xlu0 %v507_v13, %s1822_s22  ;;  %s1513_s22 = sshll.u32 %s1918_s29, 7  ;;  %s1826_s29 = smov [#allocation2]  }
 0x374   : > { %v567_v47 = vpop.xlane.xlu0 %566 }
 0x378   : > { %v888_v55 = vpop.permute.xlu0 %887 }
 0x379   : > { %v893_v57 = vsel %vm574_vm3, %v888_v55, 0 }
 0x37c   : > { %v987_v31 = vpop.permute.xlu0 %986 }
 0x3bb   : > { %v612_v34 = vpop.f32.mrb[8].mxu1 }
 0x3bc   : > { %v1573_v35 = vpop.f32.mrb[9].mxu1 }
 0x3bd   : > { %v615_v36 = vpop.f32.mrb[10].mxu1 }
 0x3be   : > { %v1574_v37 = vpop.f32.mrb[11].mxu1 }
 0x3c3   : > { %v667_v38 = vpop.f32.mrb[12].mxu1 }
 0x3c4   : > { %v1579_v39 = vpop.f32.mrb[13].mxu1  ;;  %v673_v40 = vsel %vm512_vm2, %v667_v38, -inf }
 0x3c5   : > { %674 = vmax.xlane.f32.xlu1 %v673_v40  ;;  %v670_v41 = vpop.f32.mrb[14].mxu1 }
 0x3c6   : > { %v1580_v42 = vpop.f32.mrb[15].mxu1 }
 0x452   : > { %v675_v43 = vpop.xlane.xlu1 %674 }
 0x453   : > { %v676_v44 = vsub.f32 %v667_v38, %v675_v43 }
 0x455   : > { %v677_v46 = vmul.f32 1.442695, %v676_v44 }
 0x457   : > { %1729 = vpow2.f32 %v677_v46 }
 0x458   : > { %1731 = vrcp.f32 %v567_v47 }
 0x461   : > { %v1730_v49 = vpop.eup %1729 }
 0x462   : > { %v679_v50 = vsel %vm512_vm2, %v1730_v49, 0.0  ;;  %v682_v51 = vpack.c.bf16 %v1730_v49, %v1730_v49  ;;  %v1732_v53 = vpop.eup %1731 }
 0x463   : > { %680 = vadd.xlane.f32.xlu1 %v679_v50  ;;  %v619_v54 = vmul.f32 %v1732_v53, %v612_v34 }
 0x464   : > { %1584 = vmatmul.mubr.msk.bf16.vlgmr.msra.gmra.mrb[0].mxu0 %vm512_vm2, %v682_v51 }
 0x465   : > { %1594 = vmatpush3.bf16.msra.mxu0 %v785_v52  ;;  %1595 = vmatprep.mubr.msk.bf16.mxu0 %vm1814_vm0, %v1813_v1  ;;  %v620_v56 = vpack.c.bf16 %v619_v54, %v619_v54  ;;  %v1097_v54 = vld [vmem:[%s2203_s3 + $0xc] sm:$0xf]  ;;  %s2137_s3 = scalar_lea.hbm %s2193_s13, %s1513_s22 }
 0x466   : > { %1605 = vmatprep.subr.bf16.mxu0 %v1813_v1  ;;  %v1102_v55 = vsel %vm574_vm3, %v1097_v54, 0 }
 0x46c   : > { %1596 = vmatmul.mubr.msk.bf16.vlgmr.msra.gmra.mrb[4].mxu0 %vm512_vm2, %v620_v56 }
 0x46d   : > { %1606 = vmatpush3.bf16.msra.mxu0 %v893_v57  ;;  %1607 = vmatprep.mubr.msk.bf16.mxu0 %vm1814_vm0, %v1813_v1 }
 0x46e   : > { %1617 = vmatprep.subr.bf16.mxu0 %v1813_v1 }
 0x474   : > { %829 = vrot.lane.b32.xlu1 %v1974_v10, %s1823_s30  ;;  %s1476_s30 = sshll.u32 %s429_s24, 3 }
 0x475   : > { %s431_s23 = scalar_lea.vmem [#allocation2], %s1476_s30  ;;  %s1753_s30 = sshll.u32 %s1826_s29, 4  ;;  %s1754_s30 = int_to_ptr.vmem [resolvable:$false] %s1753_s30 }
 0x476   : > { %s1413_s0 = sshll.u32 %s431_s23, 4  ;;  %s2139_s0 = int_to_ptr.vmem [resolvable:$true] %s1413_s0 }
 0x477   : > { %s1749_s16 = scalar_lea.vmem %s2139_s0, 128  ;;  %p1756_p0 = scmp.lt.s32.totalorder %s2139_s0, %s1754_s30 }
 0x478   : > { %p1750_p11 = scmp.ne.s32.totalorder %s2139_s0, %s1749_s16 }
 0x47a   : > { %p1751_p12 = pnand %p1750_p11, %p1935_p5 }
 0x47c   : > { %p1752_p13 = pneg %p1751_p12 }
 0x4f0   : > { %v681_v60 = vpop.xlane.xlu1 %680 }
 0x4f1   : > { %1733 = vrcp.f32 %v681_v60 }
 0x4f4   : > { %v830_v2 = vpop.permute.xlu1 %829 }
 0x4f5   : > { %v835_v7 = vsel %vm512_vm2, %v830_v2, 0 }
 0x4fb   : > { %v1734_v61 = vpop.eup %1733 }
 0x537   : > { %v725_v62 = vpop.f32.mrb[0].mxu0 }
 0x538   : > { %v732_v63 = vmul.f32 %v1734_v61, %v725_v62  ;;  %v1585_v0 = vpop.f32.mrb[1].mxu0 }
 0x539   : > { %v728_v4 = vpop.f32.mrb[2].mxu0 }
 0x53a   : > { %v733_v5 = vpack.c.bf16 %v732_v63, %v732_v63  ;;  %v1586_v6 = vpop.f32.mrb[3].mxu0 }
 0x53c   : > { %1590 = vmatmul.mubr.msk.bf16.vlgmr.msra.gmra.mrb[16].mxu1 %vm512_vm2, %v733_v5 }
 0x53d   : > { %1600 = vmatpush3.bf16.xpose.msra.mxu1 %v835_v7  ;;  %1601 = vmatprep.mubr.msk.bf16.mxu1 %vm1814_vm0, %v1813_v1 }
 0x53e   : > { %1611 = vmatprep.subr.bf16.mxu1 %v1813_v1 }
 0x53f   : > { %v821_v8 = vpop.f32.mrb[4].mxu0 }
 0x540   : > { %v1597_v9 = vpop.f32.mrb[5].mxu0 }
 0x541   : > { %v824_v11 = vpop.f32.mrb[6].mxu0 }
 0x542   : > { %v1598_v12 = vpop.f32.mrb[7].mxu0 }
 0x544   : > { %1602 = vmatmul.mubr.msk.bf16.vlgmr.msra.gmra.mrb[20].mxu1 %vm512_vm2, %v828_v45 }
 0x545   : > { %1613 = vmatprep.mubr.msk.bf16.mxu1 %vm1814_vm0, %v1813_v1  ;;  %1612 = vmatpush3.bf16.msra.mxu1 %v943_v33 }
 0x546   : > { %1623 = vmatprep.subr.bf16.mxu1 %v1813_v1 }
 0x60f   : > { %v775_v13 = vpop.f32.mrb[16].mxu1 }
 0x610   : > { %v2029_v14 = vadd.f32 %v821_v8, %v775_v13  ;;  %v1591_v15 = vpop.f32.mrb[17].mxu1  ;;  %v1494_v8 = vld [vmem:[%s2184_s4] ss:$0 sm:$0xff] }
 0x611   : > { %v778_v16 = vpop.f32.mrb[18].mxu1 }
 0x612   : > { %v1592_v17 = vpop.f32.mrb[19].mxu1 }
 0x617   : > { %v871_v18 = vpop.f32.mrb[20].mxu1 }
 0x618   : > { %v1603_v19 = vpop.f32.mrb[21].mxu1  ;;  %v877_v20 = vsel %vm512_vm2, %v871_v18, -inf }
 0x619   : > { %878 = vmax.xlane.f32.xlu1 %v877_v20  ;;  %v874_v21 = vpop.f32.mrb[22].mxu1 }
 0x61a   : > { %v1604_v22 = vpop.f32.mrb[23].mxu1 }
 0x61b   : > { %v1717_v22 = vld [vmem:[%s2187_s7] sm:$0xff]  }
 0x62a   : > { %988 = vrot.lane.b32.xlu1 %v1974_v10, %s1824_s20  ;;  %s1755_s20 = scalar_lea.vmem %s1754_s30, 256 }
 0x62b   : > { %p1757_p1 = scmp.lt.s32.totalorder %s1755_s20, %s1749_s16 }
 0x62d   : > { %p1758_p2 = por %p1757_p1, %p1756_p0 }
 0x62f   : > { %p1759_p3 = pnand %p1758_p2, %p1752_p13 }
 0x6a6   : > { %v879_v23 = vpop.xlane.xlu1 %878 }
 0x6a7   : > { %v880_v24 = vsub.f32 %v871_v18, %v879_v23  ;;  %v1718_v23 = vld [vmem:[%s2187_s7 + $0x8] sm:$0xff]  }
 0x6a9   : > { %v881_v25 = vmul.f32 1.442695, %v880_v24  ;;  %v1720_v24 = vld [vmem:[%s2189_s9 + $0x8] sm:$0xff]  }
 0x6aa   : > { %v989_v27 = vpop.permute.xlu1 %988 }
 0x6ab   : > { %1735 = vpow2.f32 %v881_v25  ;;  %v994_v30 = vsel %vm512_vm2, %v989_v27, 0  ;;  %v1721_v25 = vld [vmem:[%s2189_s9 + $0x10] sm:$0xff]  }
 0x6b5   : > { %v1736_v26 = vpop.eup %1735 }
 0x6b6   : > { %v883_v28 = vsel %vm512_vm2, %v1736_v26, 0.0  ;;  %v886_v29 = vpack.c.bf16 %v1736_v26, %v1736_v26 }
 0x6b7   : > { %884 = vadd.xlane.f32.xlu0 %v883_v28 }
 0x6b8   : > { %1608 = vmatmul.mubr.msk.bf16.vlgmr.msra.gmra.mrb[8].mxu0 %vm512_vm2, %v886_v29 }
 0x6b9   : > { %1618 = vmatpush3.bf16.xpose.msra.mxu0 %v994_v30  ;;  %1619 = vmatprep.mubr.msk.bf16.mxu0 %vm1814_vm0, %v1813_v1  ;;  %v1495_v30 = vld [vmem:[%s2185_s5] ss:$0 sm:$0xff] }
 0x6ba   : > { %1629 = vmatprep.subr.bf16.mxu0 %v1813_v1 }
 0x6c0   : > { %1620 = vmatmul.mubr.msk.bf16.vlgmr.msra.gmra.mrb[12].mxu0 %vm512_vm2, %v987_v31 }
 0x6c1   : > { %1631 = vmatprep.mubr.msk.bf16.mxu0 %vm1814_vm0, %v1813_v1  ;;  %1630 = vmatpush3.bf16.msra.mxu0 %v1102_v55 }
 0x6c2   : > { %1643 = vmatprep.subr.bf16.mxu0 %v1813_v1 }
 0x6cd   : > { %1046 = vrot.lane.b32.xlu0 %v1974_v10, %s1825_s21 }
 0x744   : > { %v885_v34 = vpop.xlane.xlu0 %884 }
 0x745   : > { %1737 = vrcp.f32 %v885_v34 }
 0x748   : > { %v1047_v39 = vpop.permute.xlu0 %1046 }
 0x749   : > { %v1052_v10 = vsel %vm574_vm3, %v1047_v39, 0  ;;  %v1725_v39 = vld [vmem:[%s2189_s9 + $0x30] sm:$0xff]  }
 0x74f   : > { %v1738_v35 = vpop.eup %1737 }
 0x78b   : > { %v929_v36 = vpop.f32.mrb[8].mxu0 }
 0x78c   : > { %v936_v37 = vmul.f32 %v1738_v35, %v929_v36  ;;  %v1609_v38 = vpop.f32.mrb[9].mxu0  ;;  %v1722_v36 = vld [vmem:[%s2189_s9 + $0x18] sm:$0xff]  }
 0x78d   : > { %v932_v40 = vpop.f32.mrb[10].mxu0  ;;  %v1724_v38 = vld [vmem:[%s2189_s9 + $0x28] sm:$0xff]  }
 0x78e   : > { %v937_v41 = vpack.c.bf16 %v936_v37, %v936_v37  ;;  %v1610_v42 = vpop.f32.mrb[11].mxu0  ;;  %v1723_v37 = vld [vmem:[%s2189_s9 + $0x20] sm:$0xff]   ;;  %v1726_v40 = vld [vmem:[%s2189_s9 + $0x38] sm:$0xff]  }
 0x790   : > { %1614 = vmatmul.mubr.msk.bf16.vlgmr.msra.gmra.mrb[24].mxu1 %vm512_vm2, %v937_v41  ;;  %v1497_v41 = vld [vmem:[%s2188_s8] ss:$0 sm:$0xff] }
 0x791   : > { %1624 = vmatpush3.bf16.msra.mxu1 %v1052_v10  ;;  %1625 = vmatprep.mubr.msk.bf16.mxu1 %vm1814_vm0, %v1813_v1 }
 0x792   : > { %1635 = vmatprep.subr.bf16.mxu1 %v1813_v1 }
 0x793   : > { %v1030_v43 = vpop.f32.mrb[12].mxu0 }
 0x794   : > { %v1621_v44 = vpop.f32.mrb[13].mxu0  ;;  %v1036_v45 = vsel %vm512_vm2, %v1030_v43, -inf }
 0x795   : > { %1037 = vmax.xlane.f32.xlu1 %v1036_v45  ;;  %v1033_v46 = vpop.f32.mrb[14].mxu0 }
 0x796   : > { %v1622_v47 = vpop.f32.mrb[15].mxu0 }
 0x822   : > { %v1038_v48 = vpop.xlane.xlu1 %1037 }
 0x823   : > { %v1039_v49 = vsub.f32 %v1030_v43, %v1038_v48 }
 0x825   : > { %v1040_v50 = vmul.f32 1.442695, %v1039_v49 }
 0x827   : > { %1739 = vpow2.f32 %v1040_v50 }
 0x831   : > { %v1740_v51 = vpop.eup %1739 }
 0x832   : > { %v1042_v52 = vsel %vm512_vm2, %v1740_v51, 0.0  ;;  %v1045_v53 = vpack.c.bf16 %v1740_v51, %v1740_v51  ;;  %v1501_v51 = vld [vmem:[%s2190_s10] ss:$0 sm:$0xff] }
 0x833   : > { %1043 = vadd.xlane.f32.xlu1 %v1042_v52 }
 0x834   : > { %1626 = vmatmul.mubr.msk.bf16.vlgmr.msra.gmra.mrb[28].mxu1 %vm512_vm2, %v1045_v53 }
 0x835   : > { %1639 = vmatprep.mubr.msk.bf16.mxu1 %vm1814_vm0, %v1813_v1  ;;  %1636 = vmatpush3.bf16.msra.mxu1 %v1717_v22 }
 0x836   : > { %1637 = vmatprep.subr.bf16.mxu1 %v1813_v1 }
 0x839   : > { %1638 = vmatpush3.bf16.msra.mxu1 %v1718_v23 }
 0x863   : > { %v979_v56 = vpop.f32.mrb[24].mxu1 }
 0x864   : > { %v985_v57 = vadd.f32 %v979_v56, %v2029_v14  ;;  %v1615_v58 = vpop.f32.mrb[25].mxu1 }
 0x865   : > { %v982_v59 = vpop.f32.mrb[26].mxu1 }
 0x866   : > { %v1616_v60 = vpop.f32.mrb[27].mxu1 }
 0x8c0   : > { %v1044_v61 = vpop.xlane.xlu1 %1043 }
 0x8c1   : > { %1741 = vrcp.f32 %v1044_v61 }
 0x8cb   : > { %v1742_v62 = vpop.eup %1741 }
 0x907   : > { %v1088_v63 = vpop.f32.mrb[28].mxu1 }
 0x908   : > { %v1095_v0 = vmul.f32 %v1742_v62, %v1088_v63  ;;  %v1627_v2 = vpop.f32.mrb[29].mxu1 }
 0x909   : > { %v1091_v4 = vpop.f32.mrb[30].mxu1 }
 0x90a   : > { %v1096_v5 = vpack.c.bf16 %v1095_v0, %v1095_v0  ;;  %v1628_v6 = vpop.f32.mrb[31].mxu1 }
 0x90b   : > { %v1510_v6 = vld [vmem:[%s2191_s11] ss:$0 sm:$0xff] }
 0x90c   : > { %1632 = vmatmul.mubr.msk.bf16.vlgmr.msra.gmra.mrb[16].mxu0 %vm512_vm2, %v1096_v5 }
 0x90d   : > { %1659 = vmatprep.mubr.msk.bf16.mxu0 %vm1814_vm0, %v1813_v1 }
 0x9df   : > { %v1138_v7 = vpop.f32.mrb[16].mxu0 }
 0x9e0   : > { %v1144_v9 = vadd.f32 %v1138_v7, %v985_v57  ;;  %v1633_v11 = vpop.f32.mrb[17].mxu0 }
 0x9e1   : > { %v1141_v12 = vpop.f32.mrb[18].mxu0 }
 0x9e2   : > { %v1152_v13 = vadd.f32 %v1494_v8, %v1144_v9  ;;  %v1634_v14 = vpop.f32.mrb[19].mxu0  ;;  %v1511_v8 = vld [vmem:[%s2192_s12] ss:$0 sm:$0xff] }
 0x9e4   : > { %v1153_v15 = vadd.f32 %v1152_v13, %v1964_v3  ;;  %v1719_v3 = vld [vmem:[%s2189_s9] sm:$0xff]  }
 0x9e5   : > { %1644 = vmatpush3.bf16.msra.mxu0 %v1719_v3 }
 0x9e6   : > { %v1156_v16 = vsel %vm462_vm1, %v1153_v15, 0.0  ;;  %1645 = vmatprep.subr.bf16.mxu0 %v1813_v1 }
 0x9e7   : > { %1157 = vadd.xlane.f32.xlu1 %v1156_v16 }
 0x9e9   : > { %1646 = vmatpush3.bf16.msra.mxu0 %v1720_v24 }
 0x9ea   : > { %1647 = vmatprep.subr.bf16.mxu0 %v1813_v1 }
 0x9ed   : > { %1648 = vmatpush3.bf16.msra.mxu0 %v1721_v25 }
 0x9ee   : > { %1649 = vmatprep.subr.bf16.mxu0 %v1813_v1 }
 0x9f1   : > { %1650 = vmatpush3.bf16.msra.mxu0 %v1722_v36 }
 0x9f2   : > { %1651 = vmatprep.subr.bf16.mxu0 %v1813_v1 }
 0x9f5   : > { %1652 = vmatpush3.bf16.msra.mxu0 %v1723_v37 }
 0x9f6   : > { %1653 = vmatprep.subr.bf16.mxu0 %v1813_v1 }
 0x9f9   : > { %1654 = vmatpush3.bf16.msra.mxu0 %v1724_v38 }
 0x9fa   : > { %1655 = vmatprep.subr.bf16.mxu0 %v1813_v1 }
 0x9fd   : > { %1656 = vmatpush3.bf16.msra.mxu0 %v1725_v39 }
 0x9fe   : > { %1657 = vmatprep.subr.bf16.mxu0 %v1813_v1 }
 0xa01   : > { %1658 = vmatpush3.bf16.msra.mxu0 %v1726_v40 }
 0xa74   : > { %v1158_v17 = vpop.xlane.xlu1 %1157 }
 0xa75   : > { %v1160_v18 = vmul.f32 0.03125, %v1158_v17 }
 0xa77   : > { %v1161_v19 = vsub.f32 %v1153_v15, %v1160_v18 }
 0xa79   : > { %v1162_v20 = vmul.f32 %v1161_v19, %v1161_v19 }
 0xa7b   : > { %v1163_v21 = vsel %vm462_vm1, %v1162_v20, 0.0 }
 0xa7c   : > { %1164 = vadd.xlane.f32.xlu1 %v1163_v21 }
 0xb09   : > { %v1165_v26 = vpop.xlane.xlu1 %1164 }
 0xb0a   : > { %v1166_v27 = vmul.f32 0.03125, %v1165_v26 }
 0xb0c   : > { %v1167_v28 = vadd.f32 1e-05, %v1166_v27 }
 0xb0e   : > { %1743 = vrsqrt.f32 %v1167_v28 }
 0xb18   : > { %v1744_v29 = vpop.eup %1743 }
 0xb19   : > { %v1169_v31 = vmul.f32 %v1744_v29, %v1161_v19 }
 0xb1b   : > { %v1176_v33 = vmul.f32 %v1495_v30, %v1169_v31 }
 0xb1d   : > { %v1183_v34 = vadd.f32 %v1496_v32, %v1176_v33 }
 0xb1f   : > { %v1184_v35 = vpack.c.bf16 %v1183_v34, %v1183_v34 }
 0xb21   : > { %1640 = vmatmul.mubr.msk.bf16.vlgmr.msra.gmra.mrb[32].mxu1 %vm462_vm1, %v1184_v35 }
 0xbf4   : > { %v1245_v42 = vpop.f32.mrb[32].mxu1 }
 0xbf5   : > { %v1246_v10 = vadd.f32 %v1497_v41, %v1245_v42  ;;  %v1641_v43 = vpop.f32.mrb[33].mxu1 }
 0xbf6   : > { %v1248_v44 = vpop.f32.mrb[34].mxu1 }
 0xbf7   : > { %v1252_v45 = vmul.f32 0.70710677, %v1246_v10  ;;  %v1642_v46 = vpop.f32.mrb[35].mxu1  ;;  %v1251_v48 = vmul.f32 0.5, %v1246_v10 }
 0xbf9   : > { %1745 = verf.f32 %v1252_v45 }
 0xc03   : > { %v1746_v47 = vpop.eup %1745 }
 0xc04   : > { %v1254_v49 = vadd.f32 1.0, %v1746_v47 }
 0xc06   : > { %v1255_v1 = vmul.f32 %v1254_v49, %v1251_v48 }
 0xc08   : > { %v1256_v50 = vpack.c.bf16 %v1255_v1, %v1255_v1 }
 0xc0a   : > { %1660 = vmatmul.mubr.bf16.vlgmr.msra.gmra.mrb[20].mxu0 %v1256_v50 }
 0xcdd   : > { %v1362_v52 = vpop.f32.mrb[20].mxu0 }
 0xcde   : > { %v1363_v53 = vadd.f32 %v1501_v51, %v1362_v52  ;;  %v1661_v54 = vpop.f32.mrb[21].mxu0 }
 0xcdf   : > { %v1365_v55 = vpop.f32.mrb[22].mxu0 }
 0xce0   : > { %v1662_v56 = vpop.f32.mrb[23].mxu0  ;;  %v1368_v57 = vadd.f32 %v1363_v53, %v1183_v34 }
 0xce2   : > { %v1371_v58 = vsel %vm462_vm1, %v1368_v57, 0.0 }
 0xce3   : > { %1372 = vadd.xlane.f32.xlu1 %v1371_v58 }
 0xd70   : > { %v1373_v59 = vpop.xlane.xlu1 %1372 }
 0xd71   : > { %v1374_v60 = vmul.f32 0.03125, %v1373_v59 }
 0xd73   : > { %v1375_v61 = vsub.f32 %v1368_v57, %v1374_v60 }
 0xd75   : > { %v1376_v62 = vmul.f32 %v1375_v61, %v1375_v61 }
 0xd77   : > { %v1377_v63 = vsel %vm462_vm1, %v1376_v62, 0.0 }
 0xd78   : > { %1378 = vadd.xlane.f32.xlu0 %v1377_v63 }
 0xe05   : > { %v1379_v0 = vpop.xlane.xlu0 %1378 }
 0xe06   : > { %v1380_v2 = vmul.f32 0.03125, %v1379_v0 }
 0xe08   : > { %v1381_v4 = vadd.f32 1e-05, %v1380_v2 }
 0xe0a   : > { %1747 = vrsqrt.f32 %v1381_v4 }
 0xe14   : > { %v1748_v5 = vpop.eup %1747 }
 0xe15   : > { %v1383_v7 = vmul.f32 %v1748_v5, %v1375_v61 }
 0xe17   : > { %v1390_v9 = vmul.f32 %v1510_v6, %v1383_v7 }
 0xe19   : > { %v1397_v11 = vadd.f32 %v1511_v8, %v1390_v9 }
 0xe1b   : > { %1398 = vst.msk [vmem:[%s431_s23] sm:$0xff] %vm462_vm1, %v1397_v11 }
 0xe1c   : > { %1762 = shalt.err (!%p1759_p3)
}
 0xe1d   : > { %s1763_s1 = scalar_lea.hbm %s2137_s3, 128  ;;  %s1767_s21 = scalar_lea.hbm %s2193_s13, 256 }
 0xe1e   : > { %p1764_p4 = scmp.ne.s32.totalorder %s2137_s3, %s1763_s1  ;;  %p1768_p9 = scmp.lt.u32.totalorder %s2137_s3, %s2193_s13 }
 0xe1f   : > { %p1769_p10 = scmp.lt.u32.totalorder %s1767_s21, %s1763_s1  ;;  %p1771_p12 = scmp.lt.u32.totalorder %s1763_s1, %s2137_s3 }
 0xe20   : > { %p1765_p7 = pnand %p1764_p4, %p1935_p5 }
 0xe21   : > { %p1770_p11 = por %p1769_p10, %p1768_p9 }
 0xe22   : > { %p1766_p8 = pneg %p1765_p7 }
 0xe23   : > { %p1772_p13 = por %p1771_p12, %p1770_p11 }
 0xe25   : > { %p1773_p0 = pnand %p1772_p13, %p1766_p8 }
 0xe27   : > { %1776 = shalt.err (!%p1773_p0)
}
 0xe28   : > { %1663 = dma.vmem_to_hbm [thread:$0]  (%p1935_p5), %s2139_s0, 128, %s2137_s3, %s1400_s15  }
 0xe29 PF: > { %p1669_p1 = scmp.ge.s32.totalorder %s1811_s28, 2  ;;  %s1425_s16 = sand.u32 1, %s1799_s25  }
 0xe2a   : > { %s1426_s29 = scalar_lea.sflag [#allocation3], %s1425_s16 }
 0xe2b   : > { %p1666_p2 = pnand %p1669_p1, %p1939_p6 }
 0xe2d   : > { %1794 = dma.done.wait (!%p1666_p2), %s1426_s29, 128  }
 0xe2e   : > { %1796 = vsyncadd (!%p1666_p2), %s1426_s29, 4294967168  ;;  %p23_p3 = scmp.ge.s32.totalorder %s1922_s14, 4   ;;  %s2204_s25 = smov %s1803_s26 }
 0xe2f   : > { %s2205_s26 = smov %s1807_s27  ;;  %s2206_s27 = smov %s1933_s17 }
 0xe30   : > { %s2207_s28 = smov %s1922_s14  ;;  %25 = sbr.rel (!%p23_p3) target bundleno = 8 (0x8), region = 107 }
 0xe37   :  { %1431 = vsyncpa [#allocation3], 1 }
 0xe38   :  { %1433 = vsyncpa [#allocation3 + $0x1], 1 }

</bundles_post_ra>
